<compile_context>
chip_gen: v7x
topology: tpu7x:2x2x1
jax: 0.10.0
libtpu: 0.0.40
codegen_flags: <defaults>
</compile_context>

<pallas_src>
import math

import jax
import jax.numpy as jnp
from jax.experimental import pallas as pl
from jax.experimental.pallas import tpu as pltpu


# Single-step ceiling: at or below this batch size, one grid step does it all.
_SINGLE_STEP_MAX = 1024
# Tile size for large batches (>=512-row tiles reach ~85% of HBM roofline on
# measured mem-bound kernels; also gives >=2 parallel steps for v7x's 2 TCs).
_LARGE_BLOCK_B = 512


def _round_up(n, m):
    return ((n + m - 1) // m) * m


def _fused_linear_kernel(x_ref, w_ref, b_ref, o_ref):
    # x_ref: (block_b, F)  unpadded features (full last dim -> legal BlockSpec)
    # w_ref: (F, F)        folded weight in (in, out) layout (no .T in kernel)
    # b_ref: (1, F)        folded bias
    # o_ref: (block_b, F)
    # One MXU dot + one VPU broadcast-add (the add hides under the MXU slot).
    o_ref[...] = (
        jnp.dot(x_ref[...], w_ref[...], preferred_element_type=jnp.float32)
        + b_ref[...]
    ).astype(o_ref.dtype)


def fold_net_params(w00, b00, w10, b10, dtype=jnp.float32):
    """Fold the two chained linears into one (exact: no nonlinearity between).

    Call ONCE per weight set and reuse the result — this keeps the handful of
    tiny XLA ops (matmul, transpose, bias fold) out of the per-call path.
    Returns (w_fold_t, b_fold) with w_fold_t already in (in, out) layout so
    the kernel never transposes.
    """
    w_fold_t = (w10 @ w00).T.astype(dtype)                   # (in, out)
    b_fold = (b00 @ w10.T + b10).reshape(1, -1).astype(dtype)  # (1, out)
    return w_fold_t, b_fold


@jax.jit
def net_forward(x, w_fold_t, b_fold):
    """y = (x @ w00.T + b00) @ w10.T + b10 as a single Pallas matmul.

    `w_fold_t` / `b_fold` come from `fold_net_params` (precomputed once).
    """
    B, F = x.shape
    assert w_fold_t.shape == (F, F) and b_fold.shape == (1, F)
    dtype = x.dtype

    if B <= _SINGLE_STEP_MAX:
        # One grid step, no batch padding, no output slice.
        block_b, b_pad = B, B
    else:
        block_b = _LARGE_BLOCK_B
        b_pad = _round_up(B, block_b)

    x_in = x if b_pad == B else jnp.pad(x, ((0, b_pad - B), (0, 0)))

    grid = (b_pad // block_b,)
    flops = 2 * b_pad * F * F
    bytes_accessed = 4 * (2 * b_pad * F + F * F + F)

    y = pl.pallas_call(
        _fused_linear_kernel,
        out_shape=jax.ShapeDtypeStruct((b_pad, F), dtype),
        grid=grid,
        in_specs=[
            pl.BlockSpec((block_b, F), lambda i: (i, 0)),
            pl.BlockSpec((F, F), lambda i: (0, 0)),
            pl.BlockSpec((1, F), lambda i: (0, 0)),
        ],
        out_specs=pl.BlockSpec((block_b, F), lambda i: (i, 0)),
        compiler_params=pltpu.CompilerParams(
            dimension_semantics=("parallel",)
        ),
        cost_estimate=pl.CostEstimate(
            flops=flops, transcendentals=0, bytes_accessed=bytes_accessed
        ),
    )(x_in, w_fold_t, b_fold)

    return y if b_pad == B else y[:B]


def init_linear_params(key, in_features, out_features, dtype=jnp.float32):
    """Deterministic init mimicking PyTorch nn.Linear default (uniform +-1/sqrt(in))."""
    k_w, k_b = jax.random.split(key)
    bound = 1.0 / math.sqrt(in_features)
    w = jax.random.uniform(k_w, (out_features, in_features), dtype,
                           minval=-bound, maxval=bound)
    b = jax.random.uniform(k_b, (out_features,), dtype,
                           minval=-bound, maxval=bound)
    return w, b


def _reference(x, w00, b00, w10, b10):
    return (x @ w00.T + b00) @ w10.T + b10


if __name__ == "__main__":
    key = jax.random.PRNGKey(0)
    k_x, k_l00, k_l10, k_x2, k_x3 = jax.random.split(key, 5)

    B, F = 8, 10
    x = jax.random.normal(k_x, (B, F), jnp.float32)

    # Only linears[0][0] and linears[1][0] are used in the forward pass.
    w00, b00 = init_linear_params(k_l00, F, F)
    w10, b10 = init_linear_params(k_l10, F, F)

    # Fold the weights ONCE; reuse across all forward calls.
    w_fold_t, b_fold = fold_net_params(w00, b00, w10, b10)

    # Small-batch path (single grid step, no padding, no slicing).
    y = net_forward(x, w_fold_t, b_fold)
    jax.block_until_ready(y)
    ref = _reference(x, w00, b00, w10, b10)
    assert jnp.allclose(y, ref, atol=1e-5, rtol=1e-5), "mismatch vs reference (B=8)"

    # Mid-batch path: still a single grid step (no padded rows, no 2nd step).
    B2 = 192
    x2 = jax.random.normal(k_x2, (B2, F), jnp.float32)
    y2 = net_forward(x2, w_fold_t, b_fold)
    jax.block_until_ready(y2)
    ref2 = _reference(x2, w00, b00, w10, b10)
    assert jnp.allclose(y2, ref2, atol=1e-5, rtol=1e-5), "mismatch vs reference (B=192)"

    # Large-batch path: 512-row tiles, multi-step parallel grid, row padding.
    B3 = 1200
    x3 = jax.random.normal(k_x3, (B3, F), jnp.float32)
    y3 = net_forward(x3, w_fold_t, b_fold)
    jax.block_until_ready(y3)
    ref3 = _reference(x3, w00, b00, w10, b10)
    assert jnp.allclose(y3, ref3, atol=1e-5, rtol=1e-5), "mismatch vs reference (B=1200)"

    print("KERNEL_OK")
</pallas_src>

<mosaic_0001>
module attributes {stable_mosaic.version = 11 : i64} {
  func.func @_fused_linear_kernel(%arg0: i32, %arg1: memref<8x10xf32, #tpu.memory_space<vmem>>, %arg2: memref<10x10xf32, #tpu.memory_space<vmem>>, %arg3: memref<1x10xf32, #tpu.memory_space<vmem>>, %arg4: memref<8x10xf32, #tpu.memory_space<vmem>>) attributes {dimension_semantics = [#tpu.dimension_semantics<parallel>], iteration_bounds = array<i64: 1>, scalar_prefetch = 0 : i64, scratch_operands = 0 : i64, tpu.core_type = #tpu.core_type<tc>, window_params = [{transform_indices = @transform_0, window_bounds = array<i64: 8, 10>}, {pipeline_mode = #tpu.pipeline_mode<synchronous>, transform_indices = @transform_1, window_bounds = array<i64: 10, 10>}, {pipeline_mode = #tpu.pipeline_mode<synchronous>, transform_indices = @transform_2, window_bounds = array<i64: 1, 10>}, {transform_indices = @transform_3, window_bounds = array<i64: 8, 10>}]} {
    %c0 = arith.constant 0 : index
    %c0_0 = arith.constant 0 : index
    %0 = vector.load %arg1[%c0, %c0_0] : memref<8x10xf32, #tpu.memory_space<vmem>>, vector<8x10xf32>
    %c0_1 = arith.constant 0 : index
    %c0_2 = arith.constant 0 : index
    %1 = vector.load %arg2[%c0_1, %c0_2] : memref<10x10xf32, #tpu.memory_space<vmem>>, vector<10x10xf32>
    %cst = arith.constant dense<0.000000e+00> : vector<8x10xf32>
    %2 = tpu.matmul %0, %1, %cst {dimension_numbers = #tpu.dot_dimension_numbers<[1], [0], [0], [1], [0, 0, 1, 1], [], []>} : vector<8x10xf32>, vector<10x10xf32>, vector<8x10xf32> -> vector<8x10xf32>
    %c0_3 = arith.constant 0 : index
    %c0_4 = arith.constant 0 : index
    %3 = vector.load %arg3[%c0_3, %c0_4] : memref<1x10xf32, #tpu.memory_space<vmem>>, vector<1x10xf32>
    %4 = vector.broadcast %3 : vector<1x10xf32> to vector<8x10xf32>
    %5 = arith.addf %2, %4 : vector<8x10xf32>
    %c0_5 = arith.constant 0 : index
    %c0_6 = arith.constant 0 : index
    %6 = vector.load %arg4[%c0_5, %c0_6] : memref<8x10xf32, #tpu.memory_space<vmem>>, vector<8x10xf32>
    tpu.vector_store %arg4[%c0_5, %c0_6], %5 {strides = array<i32>} : memref<8x10xf32, #tpu.memory_space<vmem>>, vector<8x10xf32>,
    return
  }
  func.func @transform_0(%arg0: i32) -> (i32, i32) {
    %c0_i32 = arith.constant 0 : i32
    %c0_i32_0 = arith.constant 0 : i32
    return %arg0, %c0_i32 : i32, i32
  }
  func.func @transform_1(%arg0: i32) -> (i32, i32) {
    %c0_i32 = arith.constant 0 : i32
    %c0_i32_0 = arith.constant 0 : i32
    %c0_i32_1 = arith.constant 0 : i32
    return %c0_i32, %c0_i32_0 : i32, i32
  }
  func.func @transform_2(%arg0: i32) -> (i32, i32) {
    %c0_i32 = arith.constant 0 : i32
    %c0_i32_0 = arith.constant 0 : i32
    %c0_i32_1 = arith.constant 0 : i32
    return %c0_i32, %c0_i32_0 : i32, i32
  }
  func.func @transform_3(%arg0: i32) -> (i32, i32) {
    %c0_i32 = arith.constant 0 : i32
    %c0_i32_0 = arith.constant 0 : i32
    return %arg0, %c0_i32 : i32, i32
  }
}

</mosaic_0001>

<bundles_post_ra>
// kernel: net_forward.1
= control target key start
LH: loop header
LB: loop body
LE: loop exit
PB: predicated region body
PF: predicated region fallthrough
CT: control target
= control target key end

     0   :  { %8 = vsyncpa [#allocation3], 0  ;;  %s319_s0 = inlined_call_operand.hbm [shape: f32[8,10], index: 0, kind: input, shape index: {}]   ;;  %s320_s1 = inlined_call_operand.hbm [shape: f32[10,10], index: 1, kind: input, shape index: {}]   ;;  %s321_s2 = inlined_call_operand.vmem [shape: f32[1,10], index: 2, kind: input, shape index: {}]   ;;  %s322_s3 = inlined_call_operand.hbm [shape: f32[8,10], index: 3, kind: output, shape index: {}]  }
   0x1   :  { %9 = vsyncpa [#allocation6], 0 }
   0x2   :  { %10 = vsyncpa [#allocation4], 0  ;;  %s244_s12 = smov [#allocation2]   ;;  %s245_s14 = smov [#allocation5]  }
   0x3   :  { %s17_s13 = sshll.u32 %s244_s12, 4  ;;  %s26_s15 = sshll.u32 %s245_s14, 4  ;;  %s18_s13 = int_to_ptr.vmem [resolvable:$true] %s17_s13  ;;  %s273_s15 = int_to_ptr.vmem [resolvable:$true] %s26_s15 }
   0x4   :  { %s172_s18 = scalar_lea.hbm %s319_s0, 128 }
   0x5   :  { %p173_p0 = scmp.ne.s32.totalorder %s319_s0, %s172_s18  ;;  %p176_p1 = scmp.lt.u32.totalorder %s172_s18, %s319_s0 }
   0x7   :  { %p178_p2 = pnand %p176_p1, %p173_p0 }
   0x9   :  { %181 = shalt.err (!%p178_p2)
}
   0xa   :  { %s182_s23 = scalar_lea.vmem %s18_s13, 128  ;;  %p187_p4 = scmp.lt.s32.totalorder %s18_s13, %s18_s13 }
   0xb   :  { %p183_p3 = scmp.ne.s32.totalorder %s18_s13, %s182_s23  ;;  %p188_p5 = scmp.lt.s32.totalorder %s182_s23, %s182_s23 }
   0xd   :  { %p189_p6 = por %p188_p5, %p187_p4 }
   0xf   :  { %p190_p7 = pnand %p189_p6, %p183_p3 }
  0x11   :  { %193 = shalt.err (!%p190_p7)
}
  0x12   :  { %20 = dma.hbm_to_vmem [thread:$0]  %s319_s0, 128, %s18_s13, [#allocation3]  }
  0x13   :  { %s194_s28 = scalar_lea.hbm %s320_s1, 256 }
  0x14   :  { %p195_p8 = scmp.ne.s32.totalorder %s320_s1, %s194_s28  ;;  %p198_p9 = scmp.lt.u32.totalorder %s194_s28, %s320_s1 }
  0x16   :  { %p200_p10 = pnand %p198_p9, %p195_p8 }
  0x18   :  { %203 = shalt.err (!%p200_p10)
}
  0x19   :  { %s204_s6 = scalar_lea.vmem %s273_s15, 256  ;;  %p209_p12 = scmp.lt.s32.totalorder %s273_s15, %s273_s15 }
  0x1a   :  { %p205_p11 = scmp.ne.s32.totalorder %s273_s15, %s204_s6  ;;  %p210_p13 = scmp.lt.s32.totalorder %s204_s6, %s204_s6 }
  0x1c   :  { %p211_p0 = por %p210_p13, %p209_p12 }
  0x1e   :  { %p212_p1 = pnand %p211_p0, %p205_p11 }
  0x20   :  { %215 = shalt.err (!%p212_p1)
}
  0x21   :  { %s246_s0 = smov 128   ;;  %s247_s7 = smov 8  }
  0x22   :  { %32 = dma.hbm_to_vmem [thread:$0]  %s320_s1, 256, %s273_s15, [#allocation6], %s246_s0, %s246_s0, %s247_s7  }
  0x23   :  { %238 = dma.done.wait [#allocation3], 128  }
  0x24   :  { %239 = vsyncadd [#allocation3], 4294967168 }
  0x25   :  { %240 = dma.done.wait [#allocation6], 256  }
  0x26   :  { %241 = vsyncadd [#allocation6], 4294967040  ;;  %v248_v0 = vmov 0.0|0.0   ;;  %vm249_vm0 = vmmov 0   ;;  %v250_v1 = vmov 0.0   ;;  %vm55_vm1 = vcmask 1041408  }
  0x27   :  { %159 = vmatprep.subr.bf16.mxu0 %v248_v0  ;;  %156 = vmatprep.mubr.msk.f32.mxu0 %vm249_vm0, %v250_v1  ;;  %v42_v2 = vld [vmem:[#allocation5] sm:$0xff]  ;;  %v43_v3 = vld [vmem:[#allocation5 + $0x8] sm:$0x3]  ;;  %vm251_vm2 = vmmov 1   ;;  %v41_v5 = vld [vmem:[#allocation2] sm:$0xff]  ;;  %vm51_vm4 = vcmask 80896  }
  0x28   :  { %vm161_vm3 = vmpackc.low %vm55_vm1, %vm251_vm2  ;;  %v160_v4 = vpack.c.bf16 %v43_v3, %v42_v2  ;;  %v146_v6 = vld [vmem:[%s321_s2] ss:$0 sm:$0xff]  ;;  %s252_s11 = smov [#allocation7]  }
  0x29   :  { %s136_s12 = sshll.u32 %s252_s11, 4  ;;  %s137_s12 = int_to_ptr.vmem [resolvable:$true] %s136_s12 }
  0x2a   :  { %162 = vmatpush3.bf16.msk.msra.mxu0 %vm161_vm3, %v160_v4  ;;  %s216_s13 = scalar_lea.vmem %s137_s12, 128  ;;  %p221_p3 = scmp.lt.s32.totalorder %s137_s12, %s137_s12 }
  0x2b   :  { %p217_p2 = scmp.ne.s32.totalorder %s137_s12, %s216_s13  ;;  %p222_p4 = scmp.lt.s32.totalorder %s216_s13, %s216_s13 }
  0x2d   :  { %157 = vmatmul.mubr.msk.f32.vlgmr.msra.gmra.mrb[0].mxu0 %vm51_vm4, %v41_v5  ;;  %p223_p5 = por %p222_p4, %p221_p3 }
  0x2f   :  { %p224_p6 = pnand %p223_p5, %p217_p2 }
 0x100   :  { %v125_v7 = vpop.f32.mrb[0].mxu0 }
 0x101   :  { %v126_v8 = vadd.f32 %v146_v6, %v125_v7  ;;  %v158_v9 = vpop.f32.mrb[1].mxu0 }
 0x103   :  { %129 = vst.msk [vmem:[#allocation7] sm:$0xff] %vm51_vm4, %v126_v8 }
 0x104   :  { %227 = shalt.err (!%p224_p6)
}
 0x105   :  { %s228_s16 = scalar_lea.hbm %s322_s3, 128 }
 0x106   :  { %p229_p7 = scmp.ne.s32.totalorder %s322_s3, %s228_s16  ;;  %p232_p8 = scmp.lt.u32.totalorder %s228_s16, %s322_s3 }
 0x108   :  { %p234_p9 = pnand %p232_p8, %p229_p7 }
 0x10a   :  { %237 = shalt.err (!%p234_p9)
}
 0x10b   :  { %139 = dma.vmem_to_hbm [thread:$0]  %s137_s12, 128, %s322_s3, [#allocation4]  }
 0x10c   :  { %242 = dma.done.wait [#allocation4], 128  }
 0x10d   :  { %243 = vsyncadd [#allocation4], 4294967168 }
 0x10e   :  { %143 = vsyncpa [#allocation3], 1 }
 0x10f   :  { %144 = vsyncpa [#allocation6], 1 }
 0x110   :  { %145 = vsyncpa [#allocation4], 1 }

</bundles_post_ra>
